<compile_context>
chip_gen: v7x
topology: tpu7x:2x2x1
jax: 0.10.0
libtpu: 0.0.40
codegen_flags: <defaults>
</compile_context>

<pallas_src>
import numpy as np
import jax
import jax.numpy as jnp
from jax import lax
from jax.experimental import pallas as pl
from jax.experimental.pallas import tpu as pltpu


def _mxu_lanes():
    """128-wide MXU on v5e-class chips, 256-wide on v6e/v7x."""
    try:
        kind = jax.devices()[0].device_kind.lower()
    except Exception:
        return 256
    for tag in ("v2", "v3", "v4", "v5 lite", "v5e", "v5litepod", "v5p", "v5"):
        if tag in kind:
            return 128
    return 256


def _effective_groups(C, G):
    """Use the real group structure only when each group fills the MXU;
    otherwise keep the dense block-diagonal weight (per-generation threshold)."""
    return G if (C // G) >= _mxu_lanes() else 1


def _pick_bt(B, C, N, Npad, M, vmem_budget=24 * 2**20):
    """Batches stacked per grid step: amortize step overhead / widen MXU N,
    keep >=2 grid steps when batch allows (dual-TC), bound per-step VMEM."""
    per_batch = C * (6 * Npad + (26 + 2 * M) * N)   # rough bytes per batch elem
    best = 1
    for bt in range(1, B + 1):
        if B % bt:
            continue
        if bt * N > 1024:                 # ~8 vregs of lanes is plenty
            break
        if B >= 4 and B // bt < 2:        # keep both TensorCores busy (v7x)
            break
        if bt * per_batch > vmem_budget:
            break
        best = bt
    return best


# -----------------------------------------------------------------------------
# Pallas kernel
# -----------------------------------------------------------------------------
def _make_kernel(*, M, C, N, D, Geff, maxd, Bt, Npad):
    Cge = C // Geff
    # Upfront bf16 cast keeps sublane slices/concats tile-aligned only when C
    # is a multiple of 16; otherwise fall back to f32 slices + per-slab cast.
    pre_cast = (C % 16 == 0)

    def kernel(xp_ref, wconv_ref, bnc_s_ref, bnc_b_ref,
               wz_ref, bnz_s_ref, bnz_b_ref, wa_ref, ba_ref,
               out_ref, att_ref):
        xp = xp_ref[0]                                        # (C, Bt*Npad) f32
        xs = xp.astype(jnp.bfloat16) if pre_cast else xp      # single upfront cast

        def lane_stack(src, off):
            # window [off, off+N) of every batch sub-slot, stacked along lanes
            if Bt == 1:
                return src[:, off:off + N]
            return jnp.concatenate(
                [src[:, t * Npad + off: t * Npad + off + N] for t in range(Bt)],
                axis=1)                                       # (C, Bt*N)

        feats = []        # per-branch activations, stored bf16 (VMEM saving)
        feats_U = None    # f32 running sum over branches
        for i in range(M):
            d = i + 1
            # 3 dilated taps, hoisted out of the group loop
            taps = [lane_stack(xs, maxd + (k - 1) * d) for k in range(3)]
            if Geff == 1:
                slab = jnp.concatenate(taps, axis=0)          # (3C, Bt*N)
                if not pre_cast:
                    slab = slab.astype(jnp.bfloat16)
                conv = jnp.dot(wconv_ref[i, 0], slab,
                               preferred_element_type=jnp.float32)
            else:
                parts = []
                for g in range(Geff):
                    r0 = g * Cge
                    slab = jnp.concatenate([t_[r0:r0 + Cge] for t_ in taps],
                                           axis=0)            # (3Cge, Bt*N)
                    if not pre_cast:
                        slab = slab.astype(jnp.bfloat16)
                    parts.append(jnp.dot(wconv_ref[i, g], slab,
                                         preferred_element_type=jnp.float32))
                conv = jnp.concatenate(parts, axis=0)
            # folded BN + ReLU (f32)
            f = jnp.maximum(conv * bnc_s_ref[i] + bnc_b_ref[i], 0.0)  # (C, Bt*N)
            feats_U = f if feats_U is None else feats_U + f
            feats.append(f.astype(jnp.bfloat16))

        # --- global average pool per batch sub-slot -> (C, Bt)
        feats_S = jnp.concatenate(
            [jnp.sum(feats_U[:, t * N:(t + 1) * N], axis=1, keepdims=True)
             for t in range(Bt)], axis=1) * (1.0 / N)

        # --- squeeze fc (1x1 conv) + folded BN + ReLU (tiny, f32)
        z = jnp.dot(wz_ref[...], feats_S, preferred_element_type=jnp.float32)
        z = jnp.maximum(z * bnz_s_ref[...] + bnz_b_ref[...], 0.0)     # (D, Bt)

        # --- per-branch attention logits + softmax over the branch dim (M)
        logits = [jnp.dot(wa_ref[i], z, preferred_element_type=jnp.float32)
                  + ba_ref[i] for i in range(M)]                      # (C, Bt)
        mx = logits[0]
        for i in range(1, M):
            mx = jnp.maximum(mx, logits[i])
        exps = [jnp.exp(l - mx) for l in logits]
        denom = exps[0]
        for i in range(1, M):
            denom = denom + exps[i]
        # approx reciprocal (EUP); switch to approx=False if att needs to sum
        # to 1 exactly downstream.
        inv = pl.reciprocal(denom, approx=True)
        atts = [e * inv for e in exps]                                # (C, Bt)

        # --- attention output: all branches / sub-slots in ONE store
        att_ref[0] = jnp.concatenate(atts, axis=1)                    # (C, M*Bt)

        # --- attention-weighted branch sum + residual + ReLU (lane-dense)
        for t in range(Bt):
            lo = t * N
            res = xp[:, t * Npad + maxd: t * Npad + maxd + N]         # f32 residual
            v = None
            for i in range(M):
                w = atts[i][:, t:t + 1] * feats[i][:, lo:lo + N].astype(jnp.float32)
                v = w if v is None else v + w
            out_ref[0, :, lo:lo + N] = jnp.maximum(v + res, 0.0)

    return kernel


def skconv_pallas(x, params, *, M, G):
    B, C, N = x.shape
    D = params["wz"].shape[0]
    Geff = _effective_groups(C, G)
    Cge = C // Geff
    maxd = M                                   # max dilation = 1 + (M-1)
    Npad = N + 2 * maxd
    Bt = _pick_bt(B, C, N, Npad, M)
    Bg = B // Bt

    # halo zero-pad, then stack Bt batch elements along the lane axis
    x_pad = jnp.pad(x, ((0, 0), (0, 0), (maxd, maxd)))
    x_stk = (x_pad.reshape(Bg, Bt, C, Npad)
                  .transpose(0, 2, 1, 3)
                  .reshape(Bg, C, Bt * Npad))

    kernel = _make_kernel(M=M, C=C, N=N, D=D, Geff=Geff, maxd=maxd,
                          Bt=Bt, Npad=Npad)

    def full(shape):
        # constant-index operand: same block every grid step.
        return pl.BlockSpec(tuple(shape), lambda b: (0,) * len(shape))

    in_specs = [
        pl.BlockSpec((1, C, Bt * Npad), lambda b: (b, 0, 0)),   # stacked padded x
        full(params["wconv"].shape),                            # (M, Geff, Cge, 3*Cge) bf16
        full(params["bnc_scale"].shape),                        # (M, C, 1)
        full(params["bnc_shift"].shape),                        # (M, C, 1)
        full(params["wz"].shape),                               # (D, C)
        full(params["bnz_scale"].shape),                        # (D, 1)
        full(params["bnz_shift"].shape),                        # (D, 1)
        full(params["wa"].shape),                               # (M, C, D)
        full(params["ba"].shape),                               # (M, C, 1)
    ]
    out_specs = (
        pl.BlockSpec((1, C, Bt * N), lambda b: (b, 0, 0)),
        pl.BlockSpec((1, C, M * Bt), lambda b: (b, 0, 0)),
    )
    out_shape = (
        jax.ShapeDtypeStruct((Bg, C, Bt * N), jnp.float32),
        jax.ShapeDtypeStruct((Bg, C, M * Bt), jnp.float32),
    )

    # advisory cost estimate for the XLA scheduler
    flops = B * (2 * M * Geff * Cge * (3 * Cge) * N   # branch convs
                 + 2 * D * C                          # squeeze fc
                 + 2 * M * C * D)                     # attention fcs
    param_bytes = sum(int(params[k].size) * params[k].dtype.itemsize
                      for k in ("wconv", "bnc_scale", "bnc_shift", "wz",
                                "bnz_scale", "bnz_shift", "wa", "ba"))
    bytes_accessed = int(B * C * Npad * 4 + B * C * N * 4
                         + B * M * C * 4 + param_bytes)
    cost = pl.CostEstimate(flops=int(flops),
                           transcendentals=int(B * M * C),
                           bytes_accessed=bytes_accessed)

    # scoped-VMEM limit sized to the actual per-step need (+25% headroom)
    step_bytes = (2 * C * Bt * Npad * 4      # double-buffered f32 input
                  + C * Bt * Npad * 2        # bf16 cast of the input tile
                  + 3 * C * Bt * N * 2       # shifted taps / slab (bf16)
                  + M * C * Bt * N * 2       # bf16 per-branch feats
                  + 3 * C * Bt * N * 4       # f32 conv/bn temp + feats_U + work
                  + 2 * C * Bt * N * 4       # double-buffered f32 output
                  + 2 * param_bytes
                  + (2 << 20))               # slack for small temporaries
    vmem_limit = int(min(100 * 2**20, max(8 * 2**20, int(step_bytes * 1.25))))

    out_stk, att_stk = pl.pallas_call(
        kernel,
        out_shape=out_shape,
        grid=(Bg,),
        in_specs=in_specs,
        out_specs=out_specs,
        compiler_params=pltpu.CompilerParams(
            dimension_semantics=("parallel",),
            vmem_limit_bytes=vmem_limit),
        cost_estimate=cost,
    )(x_stk, params["wconv"],
      params["bnc_scale"], params["bnc_shift"],
      params["wz"], params["bnz_scale"], params["bnz_shift"],
      params["wa"], params["ba"])

    # un-stack to the PyTorch layouts
    out = (out_stk.reshape(Bg, C, Bt, N)
                  .transpose(0, 2, 1, 3)
                  .reshape(B, C, N))
    att = (att_stk.reshape(Bg, C, M, Bt)
                  .transpose(0, 3, 2, 1)
                  .reshape(B, M, C)[..., None])
    return out, att


# -----------------------------------------------------------------------------
# Deterministic parameter initialization (shapes from SKConv.__init__)
# -----------------------------------------------------------------------------
def init_params(key, *, C, N, M=2, G=2, r=16, L=32):
    del N
    D = max(int(C / r), L)
    Cg = C // G
    Geff = _effective_groups(C, G)
    Cge = C // Geff
    eps = 1e-5
    ks = jax.random.split(key, 12)

    # branch convs: Conv1d(C, C, k=3, groups=G, bias=False)  -> (C, C//G, 3)
    wconv_raw = (jax.random.normal(ks[0], (M, C, Cg, 3), jnp.float32)
                 * (1.0 / np.sqrt(Cg * 3)))
    # round once to bf16 so the kernel (bf16 MXU operands) and the f32
    # reference use the exact same conv weight values.
    wconv_raw = wconv_raw.astype(jnp.bfloat16).astype(jnp.float32)

    # branch BatchNorm1d(C) params (eval mode), folded to scale/shift
    g1 = 0.5 + jax.random.uniform(ks[1], (M, C), jnp.float32)
    b1 = 0.1 * jax.random.normal(ks[2], (M, C), jnp.float32)
    m1 = 0.1 * jax.random.normal(ks[3], (M, C), jnp.float32)
    v1 = 0.5 + jax.random.uniform(ks[4], (M, C), jnp.float32)
    bnc_scale = g1 / jnp.sqrt(v1 + eps)
    bnc_shift = b1 - m1 * bnc_scale

    # fc: Conv1d(C, D, 1, bias=False) + BatchNorm1d(D)
    wz = jax.random.normal(ks[5], (D, C), jnp.float32) * (1.0 / np.sqrt(C))
    g2 = 0.5 + jax.random.uniform(ks[6], (D,), jnp.float32)
    b2 = 0.1 * jax.random.normal(ks[7], (D,), jnp.float32)
    m2 = 0.1 * jax.random.normal(ks[8], (D,), jnp.float32)
    v2 = 0.5 + jax.random.uniform(ks[9], (D,), jnp.float32)
    bnz_scale = g2 / jnp.sqrt(v2 + eps)
    bnz_shift = b2 - m2 * bnz_scale

    # fcs[i]: Conv1d(D, C, 1) with bias
    wa = jax.random.normal(ks[10], (M, C, D), jnp.float32) * (1.0 / np.sqrt(D))
    ba = 0.1 * jax.random.normal(ks[11], (M, C), jnp.float32)

    # taps-fused conv weight for the kernel: (M, Geff, Cge, 3*Cge).
    # Block-diagonal across true conv groups when the effective grouping is
    # coarser than G (dense path).
    wnp = np.asarray(wconv_raw)                      # (M, C, Cg, 3)
    wfused = np.zeros((M, Geff, Cge, 3 * Cge), np.float32)
    for i in range(M):
        for co in range(C):
            g = co // Cg              # true conv group of this output channel
            ge = co // Cge            # effective (kernel) group
            lo = co - ge * Cge        # local output row
            for k in range(3):
                for j in range(Cg):
                    li = g * Cg + j - ge * Cge   # local input column
                    wfused[i, ge, lo, k * Cge + li] = wnp[i, co, j, k]

    return dict(
        wconv_raw=wconv_raw,                              # for the reference
        wconv=jnp.asarray(wfused, dtype=jnp.bfloat16),    # kernel MXU operand
        bnc_scale=bnc_scale[..., None],                   # (M, C, 1)
        bnc_shift=bnc_shift[..., None],
        wz=wz,                                            # (D, C)
        bnz_scale=bnz_scale[:, None],                     # (D, 1)
        bnz_shift=bnz_shift[:, None],
        wa=wa,                                            # (M, C, D)
        ba=ba[..., None],                                 # (M, C, 1)
    )


# -----------------------------------------------------------------------------
# Pure-JAX reference (mirrors the PyTorch forward with eval-mode BN)
# -----------------------------------------------------------------------------
def skconv_ref(x, params, *, M, G):
    feats = []
    for i in range(M):
        di = 1 + i
        c = lax.conv_general_dilated(
            x, params["wconv_raw"][i], window_strides=(1,),
            padding=[(di, di)], rhs_dilation=(di,),
            dimension_numbers=("NCW", "OIW", "NCW"),
            feature_group_count=G)
        c = c * params["bnc_scale"][i][None] + params["bnc_shift"][i][None]
        feats.append(jax.nn.relu(c))
    feats = jnp.stack(feats, axis=1)                        # (B, M, C, N)
    feats_U = jnp.sum(feats, axis=1)                        # (B, C, N)
    feats_S = jnp.mean(feats_U, axis=2, keepdims=True)      # (B, C, 1)
    z = jnp.einsum("dc,bcl->bdl", params["wz"], feats_S)
    z = jax.nn.relu(z * params["bnz_scale"][None] + params["bnz_shift"][None])
    logits = jnp.stack(
        [jnp.einsum("cd,bdl->bcl", params["wa"][i], z) + params["ba"][i][None]
         for i in range(M)], axis=1)                        # (B, M, C, 1)
    att = jax.nn.softmax(logits, axis=1)
    feats_V = jnp.sum(feats * att, axis=1)
    out = jax.nn.relu(feats_V + x)
    return out, att


# -----------------------------------------------------------------------------
if __name__ == "__main__":
    # small but hardware-friendly shapes: C multiple of 16, N multiple of 128
    B, C, N = 2, 16, 128
    M, G = 2, 2
    key = jax.random.PRNGKey(0)
    kx, ky, kp = jax.random.split(key, 3)
    x = jax.random.normal(kx, (B, C, N), jnp.float32)
    # y is accepted by the PyTorch forward but is dead code (unused in outputs)
    y = jax.random.normal(ky, (B, C), jnp.float32)

    params = init_params(kp, C=C, N=N, M=M, G=G)

    out, att = skconv_pallas(x, params, M=M, G=G)
    out = jax.block_until_ready(out)
    att = jax.block_until_ready(att)

    ref_out, ref_att = skconv_ref(x, params, M=M, G=G)
    assert out.shape == (B, C, N) and att.shape == (B, M, C, 1)
    # bf16 conv operands / bf16 feats inside the kernel -> loosened tolerances
    assert np.allclose(np.asarray(out), np.asarray(ref_out), atol=1e-1, rtol=5e-2)
    assert np.allclose(np.asarray(att), np.asarray(ref_att), atol=3e-2, rtol=3e-2)
    print("KERNEL_OK")
</pallas_src>

<mosaic_0001>
module attributes {stable_mosaic.version = 11 : i64} {
  func.func @kernel(%arg0: i32, %arg1: memref<1x16x264xf32, #tpu.memory_space<vmem>>, %arg2: memref<2x1x16x48xbf16, #tpu.memory_space<vmem>>, %arg3: memref<2x16x1xf32, #tpu.memory_space<vmem>>, %arg4: memref<2x16x1xf32, #tpu.memory_space<vmem>>, %arg5: memref<32x16xf32, #tpu.memory_space<vmem>>, %arg6: memref<32x1xf32, #tpu.memory_space<vmem>>, %arg7: memref<32x1xf32, #tpu.memory_space<vmem>>, %arg8: memref<2x16x32xf32, #tpu.memory_space<vmem>>, %arg9: memref<2x16x1xf32, #tpu.memory_space<vmem>>, %arg10: memref<1x16x256xf32, #tpu.memory_space<vmem>>, %arg11: memref<1x16x4xf32, #tpu.memory_space<vmem>>) attributes {dimension_semantics = [#tpu.dimension_semantics<parallel>], iteration_bounds = array<i64: 1>, scalar_prefetch = 0 : i64, scratch_operands = 0 : i64, tpu.core_type = #tpu.core_type<tc>, window_params = [{transform_indices = @transform_0, window_bounds = array<i64: 1, 16, 264>}, {pipeline_mode = #tpu.pipeline_mode<synchronous>, transform_indices = @transform_1, window_bounds = array<i64: 2, 1, 16, 48>}, {pipeline_mode = #tpu.pipeline_mode<synchronous>, transform_indices = @transform_2, window_bounds = array<i64: 2, 16, 1>}, {pipeline_mode = #tpu.pipeline_mode<synchronous>, transform_indices = @transform_3, window_bounds = array<i64: 2, 16, 1>}, {pipeline_mode = #tpu.pipeline_mode<synchronous>, transform_indices = @transform_4, window_bounds = array<i64: 32, 16>}, {pipeline_mode = #tpu.pipeline_mode<synchronous>, transform_indices = @transform_5, window_bounds = array<i64: 32, 1>}, {pipeline_mode = #tpu.pipeline_mode<synchronous>, transform_indices = @transform_6, window_bounds = array<i64: 32, 1>}, {pipeline_mode = #tpu.pipeline_mode<synchronous>, transform_indices = @transform_7, window_bounds = array<i64: 2, 16, 32>}, {pipeline_mode = #tpu.pipeline_mode<synchronous>, transform_indices = @transform_8, window_bounds = array<i64: 2, 16, 1>}, {transform_indices = @transform_9, window_bounds = array<i64: 1, 16, 256>}, {transform_indices = @transform_10, window_bounds = array<i64: 1, 16, 4>}]} {
    %c0 = arith.constant 0 : index
    %c0_0 = arith.constant 0 : index
    %c0_1 = arith.constant 0 : index
    %0 = vector.load %arg1[%c0, %c0_0, %c0_1] : memref<1x16x264xf32, #tpu.memory_space<vmem>>, vector<1x16x264xf32>
    %1 = vector.shape_cast %0 : vector<1x16x264xf32> to vector<16x264xf32>
    %2 = arith.truncf %1 : vector<16x264xf32> to vector<16x264xbf16>
    %3 = vector.extract_strided_slice %2 {offsets = [0, 1], sizes = [16, 128], strides = [1, 1]} : vector<16x264xbf16> to vector<16x128xbf16>
    %4 = vector.extract_strided_slice %2 {offsets = [0, 133], sizes = [16, 128], strides = [1, 1]} : vector<16x264xbf16> to vector<16x128xbf16>
    %5 = tpu.concatenate %3, %4 in 1 : vector<16x128xbf16>, vector<16x128xbf16> -> vector<16x256xbf16>
    %6 = vector.extract_strided_slice %2 {offsets = [0, 2], sizes = [16, 128], strides = [1, 1]} : vector<16x264xbf16> to vector<16x128xbf16>
    %7 = vector.extract_strided_slice %2 {offsets = [0, 134], sizes = [16, 128], strides = [1, 1]} : vector<16x264xbf16> to vector<16x128xbf16>
    %8 = tpu.concatenate %6, %7 in 1 : vector<16x128xbf16>, vector<16x128xbf16> -> vector<16x256xbf16>
    %9 = vector.extract_strided_slice %2 {offsets = [0, 3], sizes = [16, 128], strides = [1, 1]} : vector<16x264xbf16> to vector<16x128xbf16>
    %10 = vector.extract_strided_slice %2 {offsets = [0, 135], sizes = [16, 128], strides = [1, 1]} : vector<16x264xbf16> to vector<16x128xbf16>
    %11 = tpu.concatenate %9, %10 in 1 : vector<16x128xbf16>, vector<16x128xbf16> -> vector<16x256xbf16>
    %12 = tpu.concatenate %5, %8, %11 in 0 : vector<16x256xbf16>, vector<16x256xbf16>, vector<16x256xbf16> -> vector<48x256xbf16>
    %c0_2 = arith.constant 0 : index
    %c0_3 = arith.constant 0 : index
    %c0_4 = arith.constant 0 : index
    %c0_5 = arith.constant 0 : index
    %13 = vector.load %arg2[%c0_2, %c0_3, %c0_4, %c0_5] : memref<2x1x16x48xbf16, #tpu.memory_space<vmem>>, vector<1x1x16x48xbf16>
    %14 = vector.shape_cast %13 : vector<1x1x16x48xbf16> to vector<16x48xbf16>
    %cst = arith.constant dense<0.000000e+00> : vector<16x256xf32>
    %15 = tpu.matmul %14, %12, %cst {dimension_numbers = #tpu.dot_dimension_numbers<[1], [0], [0], [1], [0, 0, 1, 1], [], []>} : vector<16x48xbf16>, vector<48x256xbf16>, vector<16x256xf32> -> vector<16x256xf32>
    %c0_6 = arith.constant 0 : index
    %c0_7 = arith.constant 0 : index
    %c0_8 = arith.constant 0 : index
    %16 = vector.load %arg3[%c0_6, %c0_7, %c0_8] : memref<2x16x1xf32, #tpu.memory_space<vmem>>, vector<1x16x1xf32>
    %17 = vector.shape_cast %16 : vector<1x16x1xf32> to vector<16x1xf32>
    %18 = vector.broadcast %17 : vector<16x1xf32> to vector<16x256xf32>
    %19 = arith.mulf %15, %18 : vector<16x256xf32>
    %c0_9 = arith.constant 0 : index
    %c0_10 = arith.constant 0 : index
    %c0_11 = arith.constant 0 : index
    %20 = vector.load %arg4[%c0_9, %c0_10, %c0_11] : memref<2x16x1xf32, #tpu.memory_space<vmem>>, vector<1x16x1xf32>
    %21 = vector.shape_cast %20 : vector<1x16x1xf32> to vector<16x1xf32>
    %22 = vector.broadcast %21 : vector<16x1xf32> to vector<16x256xf32>
    %23 = arith.addf %19, %22 : vector<16x256xf32>
    %cst_12 = arith.constant 0.000000e+00 : f32
    %24 = vector.broadcast %cst_12 : f32 to vector<16x256xf32>
    %25 = arith.maximumf %23, %24 : vector<16x256xf32>
    %26 = arith.truncf %25 : vector<16x256xf32> to vector<16x256xbf16>
    %27 = vector.extract_strided_slice %2 {offsets = [0, 0], sizes = [16, 128], strides = [1, 1]} : vector<16x264xbf16> to vector<16x128xbf16>
    %28 = vector.extract_strided_slice %2 {offsets = [0, 132], sizes = [16, 128], strides = [1, 1]} : vector<16x264xbf16> to vector<16x128xbf16>
    %29 = tpu.concatenate %27, %28 in 1 : vector<16x128xbf16>, vector<16x128xbf16> -> vector<16x256xbf16>
    %30 = vector.extract_strided_slice %2 {offsets = [0, 2], sizes = [16, 128], strides = [1, 1]} : vector<16x264xbf16> to vector<16x128xbf16>
    %31 = vector.extract_strided_slice %2 {offsets = [0, 134], sizes = [16, 128], strides = [1, 1]} : vector<16x264xbf16> to vector<16x128xbf16>
    %32 = tpu.concatenate %30, %31 in 1 : vector<16x128xbf16>, vector<16x128xbf16> -> vector<16x256xbf16>
    %33 = vector.extract_strided_slice %2 {offsets = [0, 4], sizes = [16, 128], strides = [1, 1]} : vector<16x264xbf16> to vector<16x128xbf16>
    %34 = vector.extract_strided_slice %2 {offsets = [0, 136], sizes = [16, 128], strides = [1, 1]} : vector<16x264xbf16> to vector<16x128xbf16>
    %35 = tpu.concatenate %33, %34 in 1 : vector<16x128xbf16>, vector<16x128xbf16> -> vector<16x256xbf16>
    %36 = tpu.concatenate %29, %32, %35 in 0 : vector<16x256xbf16>, vector<16x256xbf16>, vector<16x256xbf16> -> vector<48x256xbf16>
    %c1 = arith.constant 1 : index
    %c0_13 = arith.constant 0 : index
    %c0_14 = arith.constant 0 : index
    %c0_15 = arith.constant 0 : index
    %37 = vector.load %arg2[%c1, %c0_13, %c0_14, %c0_15] : memref<2x1x16x48xbf16, #tpu.memory_space<vmem>>, vector<1x1x16x48xbf16>
    %38 = vector.shape_cast %37 : vector<1x1x16x48xbf16> to vector<16x48xbf16>
    %cst_16 = arith.constant dense<0.000000e+00> : vector<16x256xf32>
    %39 = tpu.matmul %38, %36, %cst_16 {dimension_numbers = #tpu.dot_dimension_numbers<[1], [0], [0], [1], [0, 0, 1, 1], [], []>} : vector<16x48xbf16>, vector<48x256xbf16>, vector<16x256xf32> -> vector<16x256xf32>
    %c1_17 = arith.constant 1 : index
    %c0_18 = arith.constant 0 : index
    %c0_19 = arith.constant 0 : index
    %40 = vector.load %arg3[%c1_17, %c0_18, %c0_19] : memref<2x16x1xf32, #tpu.memory_space<vmem>>, vector<1x16x1xf32>
    %41 = vector.shape_cast %40 : vector<1x16x1xf32> to vector<16x1xf32>
    %42 = vector.broadcast %41 : vector<16x1xf32> to vector<16x256xf32>
    %43 = arith.mulf %39, %42 : vector<16x256xf32>
    %c1_20 = arith.constant 1 : index
    %c0_21 = arith.constant 0 : index
    %c0_22 = arith.constant 0 : index
    %44 = vector.load %arg4[%c1_20, %c0_21, %c0_22] : memref<2x16x1xf32, #tpu.memory_space<vmem>>, vector<1x16x1xf32>
    %45 = vector.shape_cast %44 : vector<1x16x1xf32> to vector<16x1xf32>
    %46 = vector.broadcast %45 : vector<16x1xf32> to vector<16x256xf32>
    %47 = arith.addf %43, %46 : vector<16x256xf32>
    %cst_23 = arith.constant 0.000000e+00 : f32
    %48 = vector.broadcast %cst_23 : f32 to vector<16x256xf32>
    %49 = arith.maximumf %47, %48 : vector<16x256xf32>
    %50 = arith.addf %25, %49 : vector<16x256xf32>
    %51 = arith.truncf %49 : vector<16x256xf32> to vector<16x256xbf16>
    %52 = vector.extract_strided_slice %50 {offsets = [0, 0], sizes = [16, 128], strides = [1, 1]} : vector<16x256xf32> to vector<16x128xf32>
    %cst_24 = arith.constant dense<0.000000e+00> : vector<16xf32>
    %53 = vector.multi_reduction <add>, %52, %cst_24 [1] : vector<16x128xf32> to vector<16xf32>
    %54 = vector.shape_cast %53 : vector<16xf32> to vector<16x1xf32>
    %55 = vector.extract_strided_slice %50 {offsets = [0, 128], sizes = [16, 128], strides = [1, 1]} : vector<16x256xf32> to vector<16x128xf32>
    %cst_25 = arith.constant dense<0.000000e+00> : vector<16xf32>
    %56 = vector.multi_reduction <add>, %55, %cst_25 [1] : vector<16x128xf32> to vector<16xf32>
    %57 = vector.shape_cast %56 : vector<16xf32> to vector<16x1xf32>
    %58 = tpu.concatenate %54, %57 in 1 : vector<16x1xf32>, vector<16x1xf32> -> vector<16x2xf32>
    %cst_26 = arith.constant 7.812500e-03 : f32
    %59 = vector.broadcast %cst_26 : f32 to vector<16x2xf32>
    %60 = arith.mulf %58, %59 : vector<16x2xf32>
    %c0_27 = arith.constant 0 : index
    %c0_28 = arith.constant 0 : index
    %61 = vector.load %arg5[%c0_27, %c0_28] : memref<32x16xf32, #tpu.memory_space<vmem>>, vector<32x16xf32>
    %cst_29 = arith.constant dense<0.000000e+00> : vector<32x2xf32>
    %62 = tpu.matmul %61, %60, %cst_29 {dimension_numbers = #tpu.dot_dimension_numbers<[1], [0], [0], [1], [0, 0, 1, 1], [], []>} : vector<32x16xf32>, vector<16x2xf32>, vector<32x2xf32> -> vector<32x2xf32>
    %c0_30 = arith.constant 0 : index
    %c0_31 = arith.constant 0 : index
    %63 = vector.load %arg6[%c0_30, %c0_31] : memref<32x1xf32, #tpu.memory_space<vmem>>, vector<32x1xf32>
    %64 = vector.broadcast %63 : vector<32x1xf32> to vector<32x2xf32>
    %65 = arith.mulf %62, %64 : vector<32x2xf32>
    %c0_32 = arith.constant 0 : index
    %c0_33 = arith.constant 0 : index
    %66 = vector.load %arg7[%c0_32, %c0_33] : memref<32x1xf32, #tpu.memory_space<vmem>>, vector<32x1xf32>
    %67 = vector.broadcast %66 : vector<32x1xf32> to vector<32x2xf32>
    %68 = arith.addf %65, %67 : vector<32x2xf32>
    %cst_34 = arith.constant 0.000000e+00 : f32
    %69 = vector.broadcast %cst_34 : f32 to vector<32x2xf32>
    %70 = arith.maximumf %68, %69 : vector<32x2xf32>
    %c0_35 = arith.constant 0 : index
    %c0_36 = arith.constant 0 : index
    %c0_37 = arith.constant 0 : index
    %71 = vector.load %arg8[%c0_35, %c0_36, %c0_37] : memref<2x16x32xf32, #tpu.memory_space<vmem>>, vector<1x16x32xf32>
    %72 = vector.shape_cast %71 : vector<1x16x32xf32> to vector<16x32xf32>
    %cst_38 = arith.constant dense<0.000000e+00> : vector<16x2xf32>
    %73 = tpu.matmul %72, %70, %cst_38 {dimension_numbers = #tpu.dot_dimension_numbers<[1], [0], [0], [1], [0, 0, 1, 1], [], []>} : vector<16x32xf32>, vector<32x2xf32>, vector<16x2xf32> -> vector<16x2xf32>
    %c0_39 = arith.constant 0 : index
    %c0_40 = arith.constant 0 : index
    %c0_41 = arith.constant 0 : index
    %74 = vector.load %arg9[%c0_39, %c0_40, %c0_41] : memref<2x16x1xf32, #tpu.memory_space<vmem>>, vector<1x16x1xf32>
    %75 = vector.shape_cast %74 : vector<1x16x1xf32> to vector<16x1xf32>
    %76 = vector.broadcast %75 : vector<16x1xf32> to vector<16x2xf32>
    %77 = arith.addf %73, %76 : vector<16x2xf32>
    %c1_42 = arith.constant 1 : index
    %c0_43 = arith.constant 0 : index
    %c0_44 = arith.constant 0 : index
    %78 = vector.load %arg8[%c1_42, %c0_43, %c0_44] : memref<2x16x32xf32, #tpu.memory_space<vmem>>, vector<1x16x32xf32>
    %79 = vector.shape_cast %78 : vector<1x16x32xf32> to vector<16x32xf32>
    %cst_45 = arith.constant dense<0.000000e+00> : vector<16x2xf32>
    %80 = tpu.matmul %79, %70, %cst_45 {dimension_numbers = #tpu.dot_dimension_numbers<[1], [0], [0], [1], [0, 0, 1, 1], [], []>} : vector<16x32xf32>, vector<32x2xf32>, vector<16x2xf32> -> vector<16x2xf32>
    %c1_46 = arith.constant 1 : index
    %c0_47 = arith.constant 0 : index
    %c0_48 = arith.constant 0 : index
    %81 = vector.load %arg9[%c1_46, %c0_47, %c0_48] : memref<2x16x1xf32, #tpu.memory_space<vmem>>, vector<1x16x1xf32>
    %82 = vector.shape_cast %81 : vector<1x16x1xf32> to vector<16x1xf32>
    %83 = vector.broadcast %82 : vector<16x1xf32> to vector<16x2xf32>
    %84 = arith.addf %80, %83 : vector<16x2xf32>
    %85 = arith.maximumf %77, %84 : vector<16x2xf32>
    %86 = arith.subf %77, %85 : vector<16x2xf32>
    %87 = math.exp %86 : vector<16x2xf32>
    %88 = arith.subf %84, %85 : vector<16x2xf32>
    %89 = math.exp %88 : vector<16x2xf32>
    %90 = arith.addf %87, %89 : vector<16x2xf32>
    %91 = tpu.reciprocal %90 {approx = true} : vector<16x2xf32> -> vector<16x2xf32>
    %92 = arith.mulf %87, %91 : vector<16x2xf32>
    %93 = arith.mulf %89, %91 : vector<16x2xf32>
    %94 = tpu.concatenate %92, %93 in 1 : vector<16x2xf32>, vector<16x2xf32> -> vector<16x4xf32>
    %c0_49 = arith.constant 0 : index
    %c0_50 = arith.constant 0 : index
    %c0_51 = arith.constant 0 : index
    %95 = vector.load %arg11[%c0_49, %c0_50, %c0_51] : memref<1x16x4xf32, #tpu.memory_space<vmem>>, vector<1x16x4xf32>
    %96 = vector.shape_cast %95 : vector<1x16x4xf32> to vector<16x4xf32>
    %97 = vector.shape_cast %94 : vector<16x4xf32> to vector<1x16x4xf32>
    tpu.vector_store %arg11[%c0_49, %c0_50, %c0_51], %97 {strides = array<i32>} : memref<1x16x4xf32, #tpu.memory_space<vmem>>, vector<1x16x4xf32>,
    %98 = vector.extract_strided_slice %1 {offsets = [0, 2], sizes = [16, 128], strides = [1, 1]} : vector<16x264xf32> to vector<16x128xf32>
    %99 = vector.extract_strided_slice %92 {offsets = [0, 0], sizes = [16, 1], strides = [1, 1]} : vector<16x2xf32> to vector<16x1xf32>
    %100 = vector.extract_strided_slice %26 {offsets = [0, 0], sizes = [16, 128], strides = [1, 1]} : vector<16x256xbf16> to vector<16x128xbf16>
    %101 = arith.extf %100 : vector<16x128xbf16> to vector<16x128xf32>
    %102 = vector.broadcast %99 : vector<16x1xf32> to vector<16x128xf32>
    %103 = arith.mulf %102, %101 : vector<16x128xf32>
    %104 = vector.extract_strided_slice %93 {offsets = [0, 0], sizes = [16, 1], strides = [1, 1]} : vector<16x2xf32> to vector<16x1xf32>
    %105 = vector.extract_strided_slice %51 {offsets = [0, 0], sizes = [16, 128], strides = [1, 1]} : vector<16x256xbf16> to vector<16x128xbf16>
    %106 = arith.extf %105 : vector<16x128xbf16> to vector<16x128xf32>
    %107 = vector.broadcast %104 : vector<16x1xf32> to vector<16x128xf32>
    %108 = arith.mulf %107, %106 : vector<16x128xf32>
    %109 = arith.addf %103, %108 : vector<16x128xf32>
    %110 = arith.addf %109, %98 : vector<16x128xf32>
    %cst_52 = arith.constant 0.000000e+00 : f32
    %111 = vector.broadcast %cst_52 : f32 to vector<16x128xf32>
    %112 = arith.maximumf %110, %111 : vector<16x128xf32>
    %c0_53 = arith.constant 0 : index
    %c0_54 = arith.constant 0 : index
    %c0_55 = arith.constant 0 : index
    %113 = vector.load %arg10[%c0_53, %c0_54, %c0_55] : memref<1x16x256xf32, #tpu.memory_space<vmem>>, vector<1x16x128xf32>
    %114 = vector.shape_cast %113 : vector<1x16x128xf32> to vector<16x128xf32>
    %115 = vector.shape_cast %112 : vector<16x128xf32> to vector<1x16x128xf32>
    tpu.vector_store %arg10[%c0_53, %c0_54, %c0_55], %115 {strides = array<i32>} : memref<1x16x256xf32, #tpu.memory_space<vmem>>, vector<1x16x128xf32>,
    %116 = vector.extract_strided_slice %1 {offsets = [0, 134], sizes = [16, 128], strides = [1, 1]} : vector<16x264xf32> to vector<16x128xf32>
    %117 = vector.extract_strided_slice %92 {offsets = [0, 1], sizes = [16, 1], strides = [1, 1]} : vector<16x2xf32> to vector<16x1xf32>
    %118 = vector.extract_strided_slice %26 {offsets = [0, 128], sizes = [16, 128], strides = [1, 1]} : vector<16x256xbf16> to vector<16x128xbf16>
    %119 = arith.extf %118 : vector<16x128xbf16> to vector<16x128xf32>
    %120 = vector.broadcast %117 : vector<16x1xf32> to vector<16x128xf32>
    %121 = arith.mulf %120, %119 : vector<16x128xf32>
    %122 = vector.extract_strided_slice %93 {offsets = [0, 1], sizes = [16, 1], strides = [1, 1]} : vector<16x2xf32> to vector<16x1xf32>
    %123 = vector.extract_strided_slice %51 {offsets = [0, 128], sizes = [16, 128], strides = [1, 1]} : vector<16x256xbf16> to vector<16x128xbf16>
    %124 = arith.extf %123 : vector<16x128xbf16> to vector<16x128xf32>
    %125 = vector.broadcast %122 : vector<16x1xf32> to vector<16x128xf32>
    %126 = arith.mulf %125, %124 : vector<16x128xf32>
    %127 = arith.addf %121, %126 : vector<16x128xf32>
    %128 = arith.addf %127, %116 : vector<16x128xf32>
    %cst_56 = arith.constant 0.000000e+00 : f32
    %129 = vector.broadcast %cst_56 : f32 to vector<16x128xf32>
    %130 = arith.maximumf %128, %129 : vector<16x128xf32>
    %c0_57 = arith.constant 0 : index
    %c0_58 = arith.constant 0 : index
    %c128 = arith.constant 128 : index
    %131 = vector.load %arg10[%c0_57, %c0_58, %c128] : memref<1x16x256xf32, #tpu.memory_space<vmem>>, vector<1x16x128xf32>
    %132 = vector.shape_cast %131 : vector<1x16x128xf32> to vector<16x128xf32>
    %133 = vector.shape_cast %130 : vector<16x128xf32> to vector<1x16x128xf32>
    tpu.vector_store %arg10[%c0_57, %c0_58, %c128], %133 {strides = array<i32>} : memref<1x16x256xf32, #tpu.memory_space<vmem>>, vector<1x16x128xf32>,
    return
  }
  func.func @transform_0(%arg0: i32) -> (i32, i32, i32) {
    %c0_i32 = arith.constant 0 : i32
    %c0_i32_0 = arith.constant 0 : i32
    %c0_i32_1 = arith.constant 0 : i32
    return %arg0, %c0_i32, %c0_i32_0 : i32, i32, i32
  }
  func.func @transform_1(%arg0: i32) -> (i32, i32, i32, i32) {
    %c0_i32 = arith.constant 0 : i32
    %c0_i32_0 = arith.constant 0 : i32
    %c0_i32_1 = arith.constant 0 : i32
    %c0_i32_2 = arith.constant 0 : i32
    %c0_i32_3 = arith.constant 0 : i32
    return %c0_i32, %c0_i32_0, %c0_i32_1, %c0_i32_2 : i32, i32, i32, i32
  }
  func.func @transform_2(%arg0: i32) -> (i32, i32, i32) {
    %c0_i32 = arith.constant 0 : i32
    %c0_i32_0 = arith.constant 0 : i32
    %c0_i32_1 = arith.constant 0 : i32
    %c0_i32_2 = arith.constant 0 : i32
    return %c0_i32, %c0_i32_0, %c0_i32_1 : i32, i32, i32
  }
  func.func @transform_3(%arg0: i32) -> (i32, i32, i32) {
    %c0_i32 = arith.constant 0 : i32
    %c0_i32_0 = arith.constant 0 : i32
    %c0_i32_1 = arith.constant 0 : i32
    %c0_i32_2 = arith.constant 0 : i32
    return %c0_i32, %c0_i32_0, %c0_i32_1 : i32, i32, i32
  }
  func.func @transform_4(%arg0: i32) -> (i32, i32) {
    %c0_i32 = arith.constant 0 : i32
    %c0_i32_0 = arith.constant 0 : i32
    %c0_i32_1 = arith.constant 0 : i32
    return %c0_i32, %c0_i32_0 : i32, i32
  }
  func.func @transform_5(%arg0: i32) -> (i32, i32) {
    %c0_i32 = arith.constant 0 : i32
    %c0_i32_0 = arith.constant 0 : i32
    %c0_i32_1 = arith.constant 0 : i32
    return %c0_i32, %c0_i32_0 : i32, i32
  }
  func.func @transform_6(%arg0: i32) -> (i32, i32) {
    %c0_i32 = arith.constant 0 : i32
    %c0_i32_0 = arith.constant 0 : i32
    %c0_i32_1 = arith.constant 0 : i32
    return %c0_i32, %c0_i32_0 : i32, i32
  }
  func.func @transform_7(%arg0: i32) -> (i32, i32, i32) {
    %c0_i32 = arith.constant 0 : i32
    %c0_i32_0 = arith.constant 0 : i32
    %c0_i32_1 = arith.constant 0 : i32
    %c0_i32_2 = arith.constant 0 : i32
    return %c0_i32, %c0_i32_0, %c0_i32_1 : i32, i32, i32
  }
  func.func @transform_8(%arg0: i32) -> (i32, i32, i32) {
    %c0_i32 = arith.constant 0 : i32
    %c0_i32_0 = arith.constant 0 : i32
    %c0_i32_1 = arith.constant 0 : i32
    %c0_i32_2 = arith.constant 0 : i32
    return %c0_i32, %c0_i32_0, %c0_i32_1 : i32, i32, i32
  }
  func.func @transform_9(%arg0: i32) -> (i32, i32, i32) {
    %c0_i32 = arith.constant 0 : i32
    %c0_i32_0 = arith.constant 0 : i32
    %c0_i32_1 = arith.constant 0 : i32
    return %arg0, %c0_i32, %c0_i32_0 : i32, i32, i32
  }
  func.func @transform_10(%arg0: i32) -> (i32, i32, i32) {
    %c0_i32 = arith.constant 0 : i32
    %c0_i32_0 = arith.constant 0 : i32
    %c0_i32_1 = arith.constant 0 : i32
    return %arg0, %c0_i32, %c0_i32_0 : i32, i32, i32
  }
}

</mosaic_0001>

<bundles_post_ra>
// kernel: tpu_custom_call.1
= control target key start
LH: loop header
LB: loop body
LE: loop exit
PB: predicated region body
PF: predicated region fallthrough
CT: control target
= control target key end

     0   :  { %s970_s23 = smov 124   ;;  %s971_s24 = smov 123   ;;  %s1253_s0 = inlined_call_operand.vmem [shape: f32[1,16,264], index: 0, kind: input, shape index: {}]   ;;  %s1254_s1 = inlined_call_operand.vmem [shape: bf16[2,1,16,48], index: 1, kind: input, shape index: {}]   ;;  %s1255_s2 = inlined_call_operand.vmem [shape: f32[2,16,1], index: 2, kind: input, shape index: {}]   ;;  %s1256_s3 = inlined_call_operand.vmem [shape: f32[2,16,1], index: 3, kind: input, shape index: {}]   ;;  %s1257_s4 = inlined_call_operand.vmem [shape: f32[32,16], index: 4, kind: input, shape index: {}]   ;;  %s1258_s5 = inlined_call_operand.vmem [shape: f32[32,1], index: 5, kind: input, shape index: {}]   ;;  %s1259_s6 = inlined_call_operand.vmem [shape: f32[32,1], index: 6, kind: input, shape index: {}]   ;;  %s1260_s7 = inlined_call_operand.vmem [shape: f32[2,16,32], index: 7, kind: input, shape index: {}]   ;;  %s1261_s8 = inlined_call_operand.vmem [shape: f32[2,16,1], index: 8, kind: input, shape index: {}]   ;;  %s1262_s9 = inlined_call_operand.hbm [shape: f32[1,16,256], index: 9, kind: output, shape index: {0}]   ;;  %s1263_s10 = inlined_call_operand.vmem [shape: f32[1,16,4], index: 10, kind: output, shape index: {1}]  }
   0x1   :  { %v1042_v0 = vld [vmem:[%s1253_s0 + $0x8] sm:$0xff]  ;;  %v1047_v1 = vld [vmem:[%s1253_s0 + $0x20] sm:$0xff]  ;;  %v1052_v2 = vld [vmem:[%s1253_s0 + $0x10] sm:$0xff] }
   0x2   :  { %v43_v3 = vpack.c.bf16 %v1047_v1, %v1042_v0  ;;  %v1059_v4 = vld [vmem:[%s1253_s0 + $0x28] sm:$0xff]  ;;  %v1064_v5 = vld [vmem:[%s1253_s0] sm:$0xff]  ;;  %v1072_v7 = vld [vmem:[%s1253_s0 + $0x18] sm:$0xff] }
   0x3   :  { %v44_v6 = vpack.c.bf16 %v1059_v4, %v1052_v2 }
   0x4   :  { %182 = vrot.lane.b32.xlu1 %v43_v3, %s970_s23  ;;  %55 = vrot.lane.b32.xlu0 %v43_v3, %s971_s24 }
   0x5   :  { %16 = vsyncpa [#allocation3], 0  ;;  %v42_v8 = vpack.c.bf16 %v1072_v7, %v1064_v5  ;;  %s972_s27 = smov 127   ;;  %s973_s28 = smov 122   ;;  %v975_v9 = vmov 0   ;;  %v144_v10 = vld [vmem:[%s1255_s2] sm:$0xff] }
   0x6   :  { %s974_s29 = smov 126   ;;  %133 = vmatprep.mubr.bf16.mxu0 %v975_v9  ;;  %243 = vmatprep.mubr.bf16.mxu1 %v975_v9  ;;  %s976_s0 = smov 121   ;;  %v826_v11 = vld [vmem:[%s1255_s2 + $0x10] sm:$0xff]  ;;  %v145_v12 = vld [vmem:[%s1255_s2 + $0x8] sm:$0xff]  ;;  %v827_v13 = vld [vmem:[%s1255_s2 + $0x18] sm:$0xff]  ;;  %vm59_vm0 = vcmask 1006592  }
   0x7   :  { %926 = vset.pattern.permute.xlu1 %v975_v9  ;;  %927 = vset.pattern.permute.xlu0 %v975_v9  ;;  %s977_s30 = smov 120   ;;  %s978_s11 = smov 125   ;;  %v160_v14 = vld [vmem:[%s1256_s3] sm:$0xff]  ;;  %v161_v15 = vld [vmem:[%s1256_s3 + $0x8] sm:$0xff]  ;;  %v828_v16 = vld [vmem:[%s1256_s3 + $0x10] sm:$0xff]  ;;  %vm186_vm1 = vcmask 1014784  }
   0x8   :  { %184 = vrot.lane.b32.xlu1 %v44_v6, %s970_s23  ;;  %57 = vrot.lane.b32.xlu0 %v44_v6, %s971_s24  ;;  %v829_v17 = vld [vmem:[%s1256_s3 + $0x18] sm:$0xff]  ;;  %vm51_vm2 = vcmask 1039360   ;;  %vm73_vm3 = vcmask 998400   ;;  %vm66_vm4 = vcmask 1031168   ;;  %vm87_vm5 = vcmask 990208   ;;  %v932_v42 = vld [vmem:[%s1254_s1] sm:$0xff]  }
   0x9   :  { %vm197_vm6 = vcmask 982016   ;;  %vm80_vm7 = vcmask 1022976   ;;  %vm97_vm8 = vcmask 392192   ;;  %v933_v45 = vld [vmem:[%s1254_s1 + $0x8] sm:$0xff]   ;;  %vm315_vm9 = vcmask 130048  }
   0xa   :  { %vm306_vm10 = vcmask 7168   ;;  %vm487_vm11 = vcmask 261120   ;;  %vm696_vm12 = vcmask 15360   ;;  %vm699_vm13 = vcmask 31744  }
   0xc   :  { %49 = vrot.lane.b32.xlu1 %v43_v3, %s972_s27  ;;  %47 = vrot.lane.b32.xlu0 %v42_v8, %s972_s27 }
  0x10   :  { %71 = vrot.lane.b32.xlu1 %v44_v6, %s973_s28  ;;  %69 = vrot.lane.b32.xlu0 %v43_v3, %s973_s28 }
  0x14   :  { %64 = vrot.lane.b32.xlu1 %v43_v3, %s974_s29  ;;  %62 = vrot.lane.b32.xlu0 %v42_v8, %s974_s29 }
  0x18   :  { %85 = vrot.lane.b32.xlu1 %v44_v6, %s976_s0  ;;  %83 = vrot.lane.b32.xlu0 %v43_v3, %s976_s0 }
  0x1c   :  { %195 = vrot.lane.b32.xlu1 %v44_v6, %s977_s30  ;;  %193 = vrot.lane.b32.xlu0 %v43_v3, %s977_s30 }
  0x20   :  { %78 = vrot.lane.b32.xlu1 %v43_v3, %s978_s11  ;;  %76 = vrot.lane.b32.xlu0 %v42_v8, %s978_s11 }
  0x24   :  { %189 = vrot.lane.b32.xlu0 %v42_v8, %s970_s23  ;;  %148 = vperm.xlu1 %926, %v144_v10  }
  0x28   :  { %259 = vperm.xlu1 %926, %v826_v11   ;;  %153 = vperm.xlu0 %927, %v145_v12  }
  0x2c   :  { %264 = vperm.xlu1 %926, %v827_v13   ;;  %164 = vperm.xlu0 %927, %v160_v14  }
  0x30   :  { %169 = vperm.xlu1 %926, %v161_v15   ;;  %276 = vperm.xlu0 %927, %v828_v16  }
  0x34   :  { %281 = vperm.xlu1 %926, %v829_v17  }
  0x76   :  { %v183_v18 = vpop.permute.xlu1 %182  ;;  %v56_v19 = vpop.permute.xlu0 %55 }
  0x7a   :  { %v185_v20 = vpop.permute.xlu1 %184  ;;  %v58_v21 = vpop.permute.xlu0 %57 }
  0x7b   :  { %v60_v22 = vsel %vm59_vm0, %v56_v19, %v58_v21  ;;  %v187_v23 = vsel %vm186_vm1, %v183_v18, %v185_v20 }
  0x7c   :  { %101 = vmatprep.subr.bf16.mxu0 %v60_v22  ;;  %211 = vmatprep.subr.bf16.mxu1 %v187_v23 }
  0x7d   :  { %212 = vmatpush1.bf16.msra.mxu1 %v42_v8 }
  0x7e   :  { %v50_v24 = vpop.permute.xlu1 %49  ;;  %v48_v25 = vpop.permute.xlu0 %47 }
  0x7f   :  { %v52_v26 = vsel %vm51_vm2, %v48_v25, %v50_v24 }
  0x80   :  { %102 = vmatpush1.bf16.msra.mxu0 %v52_v26 }
  0x82   :  { %v72_v27 = vpop.permute.xlu1 %71  ;;  %v70_v28 = vpop.permute.xlu0 %69 }
  0x83   :  { %v74_v29 = vsel %vm73_vm3, %v70_v28, %v72_v27 }
  0x84   :  { %103 = vmatprep.subr.bf16.mxu0 %v74_v29  ;;  %213 = vmatprep.subr.bf16.mxu1 %v74_v29 }
  0x86   :  { %v65_v30 = vpop.permute.xlu1 %64  ;;  %v63_v31 = vpop.permute.xlu0 %62 }
  0x87   :  { %v67_v32 = vsel %vm66_vm4, %v63_v31, %v65_v30 }
  0x88   :  { %104 = vmatpush1.bf16.msra.mxu0 %v67_v32  ;;  %214 = vmatpush1.bf16.msra.mxu1 %v67_v32 }
  0x8a   :  { %v86_v33 = vpop.permute.xlu1 %85  ;;  %v84_v34 = vpop.permute.xlu0 %83 }
  0x8b   :  { %v88_v35 = vsel %vm87_vm5, %v84_v34, %v86_v33 }
  0x8c   :  { %105 = vmatprep.subr.bf16.mxu0 %v88_v35 }
  0x8e   :  { %v196_v36 = vpop.permute.xlu1 %195  ;;  %v194_v37 = vpop.permute.xlu0 %193 }
  0x8f   :  { %v198_v38 = vsel %vm197_vm6, %v194_v37, %v196_v36  ;;  %v413_v37 = vld [vmem:[%s1258_s5] sm:$0xff] }
  0x90   :  { %215 = vmatprep.subr.bf16.mxu1 %v198_v38  ;;  %v441_v38 = vld [vmem:[%s1259_s6] sm:$0xff] }
  0x92   :  { %v79_v39 = vpop.permute.xlu1 %78  ;;  %v77_v40 = vpop.permute.xlu0 %76 }
  0x93   :  { %v81_v41 = vsel %vm80_vm7, %v77_v40, %v79_v39  ;;  %v442_v39 = vld [vmem:[%s1259_s6 + $0x8] sm:$0xff] }
  0x94   :  { %106 = vmatpush1.bf16.msra.mxu0 %v81_v41  ;;  %v414_v40 = vld [vmem:[%s1258_s5 + $0x8] sm:$0xff]  ;;  %v416_v41 = vld [vmem:[%s1258_s5 + $0x18] sm:$0xff] }
  0x96   :  { %v190_v43 = vpop.permute.xlu0 %189 }
  0x97   :  { %821 = vmatmul.mubr.msk.bf16.vlgmr.msra.gmra.mrb[0].mxu0 %vm97_vm8, %v932_v42  ;;  %v191_v44 = vsel %vm186_vm1, %v190_v43, %v183_v18  ;;  %v311_v42 = vld [vmem:[%s1257_s4] sm:$0xff]  ;;  %v415_v43 = vld [vmem:[%s1258_s5 + $0x10] sm:$0xff] }
  0x98   :  { %216 = vmatpush1.bf16.msra.mxu1 %v191_v44  ;;  %864 = vmatprep.mubr.msk.f32.mxu0 %vm315_vm9, %v311_v42  ;;  %v444_v44 = vld [vmem:[%s1259_s6 + $0x18] sm:$0xff] }
  0x9b   :  { %825 = vmatmul.mubr.msk.bf16.vlgmr.msra.gmra.mrb[0].mxu1 %vm97_vm8, %v933_v45  ;;  %v443_v45 = vld [vmem:[%s1259_s6 + $0x10] sm:$0xff] }
  0xa3   :  { %v149_v46 = vpop.permute.xlu1 %148 }
  0xa7   :  { %v260_v47 = vpop.permute.xlu1 %259  ;;  %v154_v48 = vpop.permute.xlu0 %153 }
  0xab   :  { %v265_v49 = vpop.permute.xlu1 %264  ;;  %v165_v50 = vpop.permute.xlu0 %164 }
  0xaf   :  { %v170_v54 = vpop.permute.xlu1 %169  ;;  %v277_v8 = vpop.permute.xlu0 %276 }
  0xb3   :  { %v282_v18 = vpop.permute.xlu1 %281 }
 0x16a   :  { %v135_v51 = vpop.f32.mrb[0].mxu0 }
 0x16b   :  { %v156_v52 = vmul.f32 %v149_v46, %v135_v51  ;;  %v137_v53 = vpop.f32.mrb[1].mxu0 }
 0x16c   :  { %v157_v55 = vmul.f32 %v149_v46, %v137_v53  ;;  %v139_v56 = vpop.f32.mrb[2].mxu0  ;;  %v476_v46 = vld [vmem:[%s1261_s8 + $0x8] sm:$0xff] }
 0x16d   :  { %v172_v57 = vadd.f32 %v165_v50, %v156_v52  ;;  %v158_v58 = vmul.f32 %v154_v48, %v139_v56  ;;  %v141_v59 = vpop.f32.mrb[3].mxu0 }
 0x16e   :  { %v173_v60 = vadd.f32 %v165_v50, %v157_v55  ;;  %v159_v61 = vmul.f32 %v154_v48, %v141_v59  ;;  %v245_v62 = vpop.f32.mrb[0].mxu1  ;;  %v839_v48 = vld [vmem:[%s1261_s8 + $0x18] sm:$0xff]  ;;  %v312_v59 = vld [vmem:[%s1257_s4 + $0x8] sm:$0xff] }
 0x16f   :  { %v174_v63 = vadd.f32 %v170_v54, %v158_v58  ;;  %v267_v3 = vmul.f32 %v260_v47, %v245_v62  ;;  %v247_v6 = vpop.f32.mrb[1].mxu1  ;;  %v176_v13 = vmax.f32 %v172_v57, 0.0  ;;  %v836_v62 = vld [vmem:[%s1260_s7 + $0x10] sm:$0xff] }
 0x170   :  { %v175_v10 = vadd.f32 %v170_v54, %v159_v61  ;;  %v268_v11 = vmul.f32 %v260_v47, %v247_v6  ;;  %v249_v12 = vpop.f32.mrb[2].mxu1  ;;  %v177_v19 = vmax.f32 %v173_v60, 0.0  ;;  %v475_v47 = vld [vmem:[%s1261_s8] sm:$0xff]  ;;  %v314_v60 = vld [vmem:[%s1257_s4 + $0x18] sm:$0xff] }
 0x171   :  { %v178_v14 = vmax.f32 %v174_v63, 0.0  ;;  %v284_v15 = vadd.f32 %v277_v8, %v267_v3  ;;  %v269_v16 = vmul.f32 %v265_v49, %v249_v12  ;;  %v251_v17 = vpop.f32.mrb[3].mxu1  ;;  %v473_v61 = vld [vmem:[%s1260_s7] sm:$0xff] }
 0x172   :  { %v179_v20 = vmax.f32 %v175_v10, 0.0  ;;  %v285_v21 = vadd.f32 %v277_v8, %v268_v11  ;;  %v270_v22 = vmul.f32 %v265_v49, %v251_v17  ;;  %v838_v49 = vld [vmem:[%s1261_s8 + $0x10] sm:$0xff]  ;;  %878 = vmatprep.mubr.msk.f32.mxu1 %vm487_vm11, %v473_v61 }
 0x173   :  { %v288_v23 = vmax.f32 %v284_v15, 0.0  ;;  %v286_v24 = vadd.f32 %v282_v18, %v269_v16  ;;  %v1120_v25 = vpack.c.bf16 %v178_v14, %v176_v13 }
 0x174   :  { %v289_v26 = vmax.f32 %v285_v21, 0.0  ;;  %v287_v27 = vadd.f32 %v282_v18, %v270_v22  ;;  %v1122_v28 = vpack.c.bf16 %v179_v20, %v177_v19 }
 0x175   :  { %v290_v29 = vmax.f32 %v286_v24, 0.0  ;;  %v292_v30 = vadd.f32 %v288_v23, %v176_v13 }
 0x176   :  { %v291_v31 = vmax.f32 %v287_v27, 0.0  ;;  %v293_v32 = vadd.f32 %v289_v26, %v177_v19 }
 0x177   :  { %298 = vadd.xlane.f32.xlu0 %v292_v30  ;;  %v294_v33 = vadd.f32 %v290_v29, %v178_v14  ;;  %v1124_v34 = vpack.c.bf16 %v290_v29, %v288_v23 }
 0x178   :  { %v295_v35 = vadd.f32 %v291_v31, %v179_v20  ;;  %v1126_v36 = vpack.c.bf16 %v291_v31, %v289_v26 }
 0x179   :  { %300 = vadd.xlane.f32.xlu1 %v294_v33 }
 0x17b   :  { %302 = vadd.xlane.f32.xlu0 %v293_v32 }
 0x17f   :  { %304 = vadd.xlane.f32.xlu0 %v295_v35  ;;  %v474_v35 = vld [vmem:[%s1260_s7 + $0x8] sm:$0xff] }
 0x18a   :  { %419 = vperm.xlu1 %926, %v413_v37   ;;  %v837_v37 = vld [vmem:[%s1260_s7 + $0x18] sm:$0xff]  ;;  %s980_s7 = smov 2  }
 0x18e   :  { %447 = vperm.xlu1 %926, %v441_v38   ;;  %v979_v38 = vmov 1  }
 0x192   :  { %452 = vperm.xlu1 %926, %v442_v39  }
 0x195   :  { %424 = vperm.xlu0 %927, %v414_v40  }
 0x196   :  { %434 = vperm.xlu1 %926, %v416_v41  }
 0x199   :  { %429 = vperm.xlu0 %927, %v415_v43  }
 0x19a   :  { %462 = vperm.xlu1 %926, %v444_v44  }
 0x19d   :  { %457 = vperm.xlu0 %927, %v443_v45  }
 0x19e   :  { %484 = vperm.xlu1 %926, %v476_v46  }
 0x1a1   :  { %479 = vperm.xlu0 %927, %v475_v47  }
 0x1a2   :  { %582 = vperm.xlu1 %926, %v839_v48  }
 0x1a5   :  { %577 = vperm.xlu0 %927, %v838_v49  }
 0x1a6   :  { %734 = vrot.lane.b32.xlu1 %v1064_v5, %s974_s29  ;;  %v313_v5 = vld [vmem:[%s1257_s4 + $0x10] sm:$0xff] }
 0x1a9   :  { %736 = vrot.lane.b32.xlu0 %v1042_v0, %s974_s29 }
 0x1aa   :  { %929 = vset.pattern.permute.xlu0 %v979_v38 }
 0x204   :  { %v299_v50 = vpop.xlane.xlu0 %298 }
 0x206   :  { %v301_v53 = vpop.xlane.xlu1 %300 }
 0x208   :  { %v303_v51 = vpop.xlane.xlu0 %302 }
 0x209   :  { %v307_v52 = vsel %vm306_vm10, %v299_v50, %v303_v51 }
 0x20a   :  { %v309_v56 = vmul.f32 0.0078125, %v307_v52  ;;  %v420_v63 = vpop.permute.xlu1 %419 }
 0x20c   :  { %v305_v54 = vpop.xlane.xlu0 %304 }
 0x20d   :  { %v308_v55 = vsel %vm306_vm10, %v301_v53, %v305_v54 }
 0x20e   :  { %v310_v57 = vmul.f32 0.0078125, %v308_v55  ;;  %v448_v3 = vpop.permute.xlu1 %447 }
 0x210   :  { %v892_v58 = vpack.c.bf16 %v310_v57, %v309_v56 }
 0x212   :  { %893 = vmatprep.subr.bf16.mxu0 %v892_v58  ;;  %v453_v6 = vpop.permute.xlu1 %452 }
 0x213   :  { %895 = vmatpush3.bf16.msra.mxu0 %v892_v58 }
 0x214   :  { %v425_v8 = vpop.permute.xlu0 %424 }
 0x216   :  { %865 = vmatmul.mubr.msk.f32.vlgmr.msra.gmra.mrb[4].mxu0 %vm315_vm9, %v312_v59  ;;  %v435_v10 = vpop.permute.xlu1 %434 }
 0x217   :  { %867 = vmatprep.mubr.msk.f32.mxu0 %vm315_vm9, %v313_v5 }
 0x218   :  { %v430_v12 = vpop.permute.xlu0 %429 }
 0x21a   :  { %868 = vmatmul.mubr.msk.f32.gmra.mrb[6].mxu0 %vm315_vm9, %v314_v60  ;;  %v463_v22 = vpop.permute.xlu1 %462 }
 0x21b   :  { %889 = vmatprep.mubr.msk.f32.mxu0 %vm487_vm11, %v836_v62 }
 0x21c   :  { %v458_v26 = vpop.permute.xlu0 %457 }
 0x21e   :  { %v485_v39 = vpop.permute.xlu1 %484 }
 0x220   :  { %v480_v40 = vpop.permute.xlu0 %479 }
 0x222   :  { %v583_v41 = vpop.permute.xlu1 %582 }
 0x224   :  { %v578_v42 = vpop.permute.xlu0 %577 }
 0x2e9   :  { %v866_v11 = vpop.f32.mrb[4].mxu0 }
 0x2ea   :  { %v438_v13 = vmul.f32 %v866_v11, %v425_v8  ;;  %v394_v14 = vpop.f32.mrb[5].mxu0 }
 0x2eb   :  { %v437_v15 = vmul.f32 %v420_v63, %v394_v14 }
 0x2ec   :  { %v466_v16 = vadd.f32 %v453_v6, %v438_v13 }
 0x2ed   :  { %v465_v17 = vadd.f32 %v448_v3, %v437_v15  ;;  %v869_v18 = vpop.f32.mrb[6].mxu0 }
 0x2ee   :  { %v470_v19 = vmax.f32 %v466_v16, 0.0  ;;  %v440_v20 = vmul.f32 %v869_v18, %v435_v10  ;;  %v404_v21 = vpop.f32.mrb[7].mxu0 }
 0x2ef   :  { %v469_v23 = vmax.f32 %v465_v17, 0.0  ;;  %v439_v24 = vmul.f32 %v430_v12, %v404_v21  ;;  %v703_v17 = vunpack.c.h.bf16 %v1120_v25 }
 0x2f0   :  { %v468_v27 = vadd.f32 %v463_v22, %v440_v20  ;;  %v754_v22 = vunpack.c.h.bf16 %v1122_v28 }
 0x2f1   :  { %v896_v29 = vpack.c.bf16 %v470_v19, %v469_v23  ;;  %v467_v30 = vadd.f32 %v458_v26, %v439_v24  ;;  %v716_v23 = vunpack.c.l.bf16 %v1124_v34 }
 0x2f2   :  { %v472_v31 = vmax.f32 %v468_v27, 0.0 }
 0x2f3   :  { %v471_v32 = vmax.f32 %v467_v30, 0.0  ;;  %897 = vmatprep.subr.bf16.mxu1 %v896_v29  ;;  %905 = vmatprep.subr.bf16.mxu0 %v896_v29 }
 0x2f4   :  { %899 = vmatpush3.bf16.msra.mxu1 %v896_v29  ;;  %907 = vmatpush3.bf16.msra.mxu0 %v896_v29 }
 0x2f5   :  { %v900_v33 = vpack.c.bf16 %v472_v31, %v471_v32 }
 0x2f7   :  { %901 = vmatprep.subr.bf16.mxu1 %v900_v33  ;;  %909 = vmatprep.subr.bf16.mxu0 %v900_v33 }
 0x2f8   :  { %903 = vmatpush3.bf16.msra.mxu1 %v900_v33  ;;  %911 = vmatpush3.bf16.msra.mxu0 %v900_v33 }
 0x2fb   :  { %879 = vmatmul.mubr.msk.f32.vlgmr.msra.gmra.mrb[4].mxu1 %vm487_vm11, %v474_v35  ;;  %890 = vmatmul.mubr.msk.f32.vlgmr.msra.gmra.mrb[8].mxu0 %vm487_vm11, %v837_v37  ;;  %v765_v35 = vunpack.c.l.bf16 %v1126_v36 }
 0x3ce   :  { %v880_v43 = vpop.f32.mrb[4].mxu1  ;;  %v891_v44 = vpop.f32.mrb[8].mxu0 }
 0x3cf   :  { %v566_v45 = vadd.f32 %v880_v43, %v485_v39  ;;  %v663_v46 = vadd.f32 %v891_v44, %v583_v41  ;;  %v560_v47 = vpop.f32.mrb[5].mxu1  ;;  %v657_v48 = vpop.f32.mrb[9].mxu0  ;;  %v753_v39 = vunpack.c.l.bf16 %v1122_v28 }
 0x3d0   :  { %v561_v49 = vadd.f32 %v560_v47, %v480_v40  ;;  %v658_v50 = vadd.f32 %v657_v48, %v578_v42 }
 0x3d1   :  { %v667_v51 = vmax.f32 %v566_v45, %v663_v46 }
 0x3d2   :  { %v666_v52 = vmax.f32 %v561_v49, %v658_v50 }
 0x3d3   :  { %v669_v53 = vsub.f32 %v566_v45, %v667_v51  ;;  %v675_v54 = vsub.f32 %v663_v46, %v667_v51 }
 0x3d4   :  { %v668_v55 = vsub.f32 %v561_v49, %v666_v52  ;;  %v674_v56 = vsub.f32 %v658_v50, %v666_v52 }
 0x3d5   :  { %v672_v57 = vmul.f32 1.442695, %v669_v53  ;;  %v678_v58 = vmul.f32 1.442695, %v675_v54 }
 0x3d6   :  { %v670_v59 = vmul.f32 1.442695, %v668_v55  ;;  %v676_v5 = vmul.f32 1.442695, %v674_v56 }
 0x3d7   :  { %934 = vpow2.f32 %v672_v57 }
 0x3d8   :  { %936 = vpow2.f32 %v678_v58 }
 0x3d9   :  { %938 = vpow2.f32 %v670_v59 }
 0x3da   :  { %940 = vpow2.f32 %v676_v5 }
 0x3e1   :  { %v935_v60 = vpop.eup %934 }
 0x3e2   :  { %v937_v61 = vpop.eup %936 }
 0x3e3   :  { %v939_v62 = vpop.eup %938  ;;  %v681_v63 = vadd.f32 %v937_v61, %v935_v60 }
 0x3e4   :  { %v941_v3 = vpop.eup %940 }
 0x3e5   :  { %v680_v6 = vadd.f32 %v941_v3, %v939_v62  ;;  %942 = vrcp.f32 %v681_v63 }
 0x3e7   :  { %944 = vrcp.f32 %v680_v6 }
 0x3ef   :  { %v943_v8 = vpop.eup %942 }
 0x3f0   :  { %v687_v10 = vmul.f32 %v943_v8, %v937_v61  ;;  %v1200_v11 = vmul.f32 %v943_v8, %v935_v60 }
 0x3f1   :  { %v945_v12 = vpop.eup %944 }
 0x3f2   :  { %772 = vperm.xlu0 %929, %v687_v10   ;;  %711 = vperm.xlu1 %926, %v1200_v11   ;;  %v1203_v13 = vmul.f32 %v945_v12, %v939_v62  ;;  %v686_v14 = vmul.f32 %v945_v12, %v941_v3 }
 0x3f6   :  { %930 = vset.pattern.permute.xlu0 %v975_v9  ;;  %723 = vperm.xlu1 %926, %v687_v10   ;;  %v735_v9 = vpop.permute.xlu1 %734 }
 0x3f7   :  { %706 = vperm.xlu0 %930, %v1203_v13  }
 0x3fa   :  { %928 = vset.pattern.permute.xlu1 %v979_v38 }
 0x3fb   :  { %760 = vperm.xlu1 %928, %v1200_v11   ;;  %719 = vperm.xlu0 %930, %v686_v14  }
 0x3ff   :  { %768 = vperm.xlu1 %928, %v686_v14   ;;  %931 = vset.pattern.permute.xlu0 %v979_v38 }
 0x400   :  { %756 = vperm.xlu0 %931, %v1203_v13  }
 0x403   :  { %738 = vrot.lane.b32.xlu1 %v1072_v7, %s974_s29  ;;  %v737_v7 = vpop.permute.xlu0 %736 }
 0x404   :  { %740 = vrot.lane.b32.xlu0 %v1047_v1, %s974_s29  ;;  %v743_v37 = vsel %vm66_vm4, %v735_v9, %v737_v7 }
 0x407   :  { %781 = vrot.lane.b32.xlu1 %v1042_v0, %s973_s28  ;;  %v717_v0 = vunpack.c.h.bf16 %v1124_v34 }
 0x408   :  { %783 = vrot.lane.b32.xlu0 %v1052_v2, %s973_s28 }
 0x40b   :  { %785 = vrot.lane.b32.xlu1 %v1047_v1, %s973_s28  ;;  %v766_v1 = vunpack.c.h.bf16 %v1126_v36 }
 0x40c   :  { %787 = vrot.lane.b32.xlu0 %v1059_v4, %s973_s28  ;;  %v702_v4 = vunpack.c.l.bf16 %v1120_v25  ;;  %s981_s28 = smov [#allocation2]  }
 0x40d   :  { %s805_s29 = sshll.u32 %s981_s28, 4  ;;  %s806_s29 = int_to_ptr.vmem [resolvable:$true] %s805_s29 }
 0x40e   :  { %s946_s2 = scalar_lea.vmem %s806_s29, 512  ;;  %p951_p1 = scmp.lt.s32.totalorder %s806_s29, %s806_s29 }
 0x40f   :  { %690 = vrot.lane.b32.xlu1 %v686_v14, %s980_s7  ;;  %p947_p0 = scmp.ne.s32.totalorder %s806_s29, %s946_s2  ;;  %p952_p2 = scmp.lt.s32.totalorder %s946_s2, %s946_s2 }
 0x410   :  { %692 = vrot.lane.b32.xlu0 %v687_v10, %s980_s7 }
 0x411   :  { %p953_p3 = por %p952_p2, %p951_p1 }
 0x413   :  { %p954_p4 = pnand %p953_p3, %p947_p0 }
 0x471   :  { %v712_v15 = vpop.permute.xlu1 %711  ;;  %v773_v16 = vpop.permute.xlu0 %772 }
 0x472   :  { %v715_v19 = vmul.f32 %v712_v15, %v703_v17  ;;  %v776_v27 = vmul.f32 %v773_v16, %v766_v1 }
 0x475   :  { %v724_v18 = vpop.permute.xlu1 %723 }
 0x476   :  { %v727_v2 = vmul.f32 %v724_v18, %v717_v0  ;;  %v707_v20 = vpop.permute.xlu0 %706 }
 0x477   :  { %v714_v29 = vmul.f32 %v707_v20, %v702_v4 }
 0x478   :  { %v729_v21 = vadd.f32 %v727_v2, %v715_v19 }
 0x47a   :  { %v761_v24 = vpop.permute.xlu1 %760  ;;  %v720_v26 = vpop.permute.xlu0 %719 }
 0x47b   :  { %v764_v30 = vmul.f32 %v761_v24, %v754_v22  ;;  %v726_v31 = vmul.f32 %v720_v26, %v716_v23 }
 0x47d   :  { %v778_v32 = vadd.f32 %v776_v27, %v764_v30  ;;  %v728_v33 = vadd.f32 %v726_v31, %v714_v29 }
 0x47e   :  { %v769_v38 = vpop.permute.xlu1 %768 }
 0x47f   :  { %v747_v25 = vadd.f32 %v743_v37, %v728_v33  ;;  %v775_v40 = vmul.f32 %v769_v38, %v765_v35  ;;  %v757_v41 = vpop.permute.xlu0 %756 }
 0x480   :  { %v763_v42 = vmul.f32 %v757_v41, %v753_v39 }
 0x481   :  { %v749_v34 = vmax.f32 %v747_v25, 0.0 }
 0x482   :  { %v777_v43 = vadd.f32 %v775_v40, %v763_v42  ;;  %v739_v44 = vpop.permute.xlu1 %738 }
 0x483   :  { %751 = vst [vmem:[#allocation2] sm:$0xff] %v749_v34  ;;  %v741_v45 = vpop.permute.xlu0 %740 }
 0x484   :  { %v744_v46 = vsel %vm66_vm4, %v739_v44, %v741_v45 }
 0x485   :  { %v748_v47 = vadd.f32 %v744_v46, %v729_v21 }
 0x486   :  { %v782_v48 = vpop.permute.xlu1 %781 }
 0x487   :  { %v750_v49 = vmax.f32 %v748_v47, 0.0  ;;  %v784_v36 = vpop.permute.xlu0 %783 }
 0x488   :  { %v790_v50 = vsel %vm73_vm3, %v782_v48, %v784_v36 }
 0x489   :  { %752 = vst [vmem:[#allocation2 + $0x10] sm:$0xff] %v750_v49  ;;  %v794_v51 = vadd.f32 %v790_v50, %v777_v43 }
 0x48a   :  { %v786_v28 = vpop.permute.xlu1 %785 }
 0x48b   :  { %v796_v52 = vmax.f32 %v794_v51, 0.0  ;;  %v788_v53 = vpop.permute.xlu0 %787 }
 0x48c   :  { %v791_v54 = vsel %vm73_vm3, %v786_v28, %v788_v53 }
 0x48d   :  { %798 = vst [vmem:[#allocation2 + $0x8] sm:$0xff] %v796_v52  ;;  %v795_v55 = vadd.f32 %v791_v54, %v778_v32 }
 0x48e   :  { %v691_v56 = vpop.permute.xlu1 %690 }
 0x48f   :  { %v797_v57 = vmax.f32 %v795_v55, 0.0  ;;  %v697_v58 = vsel %vm696_vm12, %v1203_v13, %v691_v56  ;;  %v693_v59 = vpop.permute.xlu0 %692 }
 0x490   :  { %700 = vst.msk [vmem:[%s1263_s10] sm:$0xff] %vm699_vm13, %v697_v58  ;;  %v698_v5 = vsel %vm696_vm12, %v1200_v11, %v693_v59 }
 0x491   :  { %799 = vst [vmem:[#allocation2 + $0x18] sm:$0xff] %v797_v57  ;;  %701 = vst.msk [vmem:[%s1263_s10 + $0x8] sm:$0xff] %vm699_vm13, %v698_v5 }
 0x492   :  { %957 = shalt.err (!%p954_p4)
}
 0x493   :  { %s958_s30 = scalar_lea.hbm %s1262_s9, 512 }
 0x494   :  { %p959_p5 = scmp.ne.s32.totalorder %s1262_s9, %s958_s30  ;;  %p962_p6 = scmp.lt.u32.totalorder %s958_s30, %s1262_s9 }
 0x496   :  { %p964_p7 = pnand %p962_p6, %p959_p5 }
 0x498   :  { %967 = shalt.err (!%p964_p7)
}
 0x499   :  { %s982_s10 = smov 256   ;;  %s983_s6 = smov 16  }
 0x49a   :  { %811 = dma.vmem_to_hbm [thread:$0]  %s806_s29, 512, %s1262_s9, [#allocation3], %s982_s10, %s982_s10, %s983_s6  }
 0x49b   :  { %968 = dma.done.wait [#allocation3], 512  }
 0x49c   :  { %969 = vsyncadd [#allocation3], 4294966784 }
 0x49d   :  { %819 = vsyncpa [#allocation3], 1 }

</bundles_post_ra>
